<compile_context>
chip_gen: v7x
topology: tpu7x:2x2x1
jax: 0.10.0
libtpu: 0.0.40
codegen_flags: <defaults>
</compile_context>

<pallas_src>
import functools

import jax
import jax.numpy as jnp
from jax.experimental import pallas as pl
from jax.experimental.pallas import tpu as pltpu


def _round_up(x, m):
    return (x + m - 1) // m * m


def _encoder_kernel(W, feat_ref, w_ref, tokens_ref, global_ref, y_ref):
    """One (batch element, hid tile) grid step.

    W:          true (unpadded) feature-map width (static)
    feat_ref:   (1, H, W_p, Cf_p)      backbone features (bf16), W padded to 8
    w_ref:      (Cf_p, TN)             rescale_conv 1x1 weight tile, transposed (bf16)
    tokens_ref: (1, (H-1)*(W-1), TN)   flat pooled/clamped token map (f32)
    global_ref: (1, 1, TN)             spatial amax of the pooled map (f32)
    y_ref:      (H, W_p, TN)           VMEM scratch: 1x1-conv result
    """
    _, H, W_p, Cf_p = feat_ref.shape
    TN = w_ref.shape[1]

    # 1x1 conv == one per-pixel MXU matmul (M = H*W_p amortizes fill/drain).
    # Both reshapes are free views because W_p is a multiple of 8 (sublane-aligned).
    feat2d = feat_ref[...].reshape(H * W_p, Cf_p)
    y_ref[...] = jnp.dot(feat2d, w_ref[...],
                         preferred_element_type=jnp.float32).reshape(H, W_p, TN)

    # AvgPool2d(kernel_size=2, stride=1): vertical pair sums on the untiled leading
    # axis (cheap, reused for both horizontal taps), kept as a value (no slab store).
    vsum = y_ref[0:H - 1, :, :] + y_ref[1:H, :, :]               # (H-1, W_p, TN)
    pooled = (vsum[:, 0:W - 1, :] + vsum[:, 1:W, :]) * 0.25      # (H-1, W-1, TN)

    # torch.nan_to_num(nan=0, posinf=1e4, neginf=-1e4) + clamp(-1e4, 1e4):
    # clip already maps +-inf onto the bounds, so only the NaN select remains.
    pooled = jnp.where(jnp.isnan(pooled), 0.0,
                       jnp.clip(pooled, -10000.0, 10000.0))

    # Flat token-map store (== x.flatten(2).permute(0, 2, 1) for this hid tile):
    # one (W-1, TN) row strip per pooled row, static offsets, lane-dense last dim.
    for r in range(H - 1):
        tokens_ref[0, r * (W - 1):(r + 1) * (W - 1), :] = pooled[r]

    # x.amax(dim=[2, 3]): elementwise VPU max across the (H-1) row slabs first,
    # then a single cross-sublane (XLU) reduce over the remaining (W-1) rows.
    row_max = jnp.max(pooled, axis=0)                            # (W-1, TN)
    global_ref[0, :, :] = jnp.max(row_max, axis=0, keepdims=True)


def _pick_hid_tile(hid_p):
    # Largest multiple of 128 that divides hid_p and is <= 512: keeps the 256-wide
    # MXU on v6e/v7x fed while giving the grid enough steps to pipeline.
    for cand in (512, 384, 256, 128):
        if hid_p % cand == 0:
            return cand
    return 128


def _vmem_limit_bytes(per_step_bytes):
    # Generation-aware cap: v7x has 64 MiB VMEM per TensorCore, v5e/v6e have 128 MiB.
    try:
        cap = pltpu.get_tpu_info().vmem_capacity_bytes
    except Exception:
        cap = 64 * 1024 * 1024  # conservative (v7x-sized) fallback
    usable = min(100 * 1024 * 1024, cap - 12 * 1024 * 1024)
    want = max(16 * 1024 * 1024, int(1.5 * per_step_bytes))
    return int(max(4 * 1024 * 1024, min(usable, want)))


def image_encode(feat_nhwc, rescale_conv_weight):
    """Post-backbone part of ImageEncoderEfficientNet.forward.

    feat_nhwc:           (B, H, W, Cf)   output of the backbone, channels-last
    rescale_conv_weight: (hid, Cf, 1, 1) nn.Conv2d(Cf, hid, 1, bias=False) weight (OIHW)
    returns (image_tokens [B, (H-1)*(W-1), hid], global_embedding [B, 1, hid])
    """
    B, H, W, Cf = feat_nhwc.shape
    hid = rescale_conv_weight.shape[0]

    # Pad channels to 128 (lane-dense MXU operands / unmasked stores) and W to a
    # multiple of 8 (sublane-aligned in-kernel reshapes and vertical-tap slices).
    Cf_p = _round_up(Cf, 128)
    hid_p = _round_up(hid, 128)
    W_p = _round_up(W, 8)
    TN = _pick_hid_tile(hid_p)
    n_tok = (H - 1) * (W - 1)

    w = jnp.transpose(rescale_conv_weight[:, :, 0, 0], (1, 0)).astype(jnp.bfloat16)
    if (Cf_p, hid_p) != (Cf, hid):
        w = jnp.pad(w, ((0, Cf_p - Cf), (0, hid_p - hid)))

    # bf16 MXU inputs (f32 accumulation inside the kernel); halves feature-map DMA bytes.
    feat = feat_nhwc.astype(jnp.bfloat16)
    if (W_p, Cf_p) != (W, Cf):
        feat = jnp.pad(feat, ((0, 0), (0, 0), (0, W_p - W), (0, Cf_p - Cf)))

    # Per-step VMEM: double-buffered feature / weight tile / outputs, y scratch,
    # plus the vsum / pooled temporaries the compiler materializes.
    per_step = (2 * H * W_p * Cf_p * 2
                + 2 * Cf_p * TN * 2
                + 2 * n_tok * TN * 4
                + 2 * TN * 4
                + H * W_p * TN * 4
                + (H - 1) * W_p * TN * 4
                + n_tok * TN * 4)

    kernel = functools.partial(_encoder_kernel, W)

    tokens, gmax = pl.pallas_call(
        kernel,
        out_shape=(
            jax.ShapeDtypeStruct((B, n_tok, hid_p), jnp.float32),
            jax.ShapeDtypeStruct((B, 1, hid_p), jnp.float32),
        ),
        grid_spec=pltpu.PrefetchScalarGridSpec(
            num_scalar_prefetch=0,
            grid=(B, hid_p // TN),
            in_specs=[
                # feature block is revisited across the hid-tile axis (no re-DMA)
                pl.BlockSpec((1, H, W_p, Cf_p), lambda b, j: (b, 0, 0, 0)),
                pl.BlockSpec((Cf_p, TN), lambda b, j: (0, j)),
            ],
            out_specs=[
                pl.BlockSpec((1, n_tok, TN), lambda b, j: (b, 0, j)),
                pl.BlockSpec((1, 1, TN), lambda b, j: (b, 0, j)),
            ],
            scratch_shapes=[
                pltpu.VMEM((H, W_p, TN), jnp.float32),
            ],
        ),
        compiler_params=pltpu.CompilerParams(
            # both grid axes are independent -> shardable across v7x's two TensorCores
            dimension_semantics=("parallel", "parallel"),
            vmem_limit_bytes=_vmem_limit_bytes(per_step),
        ),
    )(feat, w)

    if hid_p != hid:
        tokens = tokens[..., :hid]
        gmax = gmax[..., :hid]

    # tokens is already the flat (B, (H-1)*(W-1), hid) map; gmax == amax(dim=[2,3]).unsqueeze(1)
    return tokens, gmax


def standin_backbone(img_nchw, backbone_w):
    # TODO(synk): the timm tf_efficientnet_b5 pretrained backbone (self.model truncated by
    # [:-2]) has no clean Pallas equivalent without its checkpoint; this deterministic
    # strided-conv + ReLU stand-in produces the [B, H, W, Cf] feature map (emitted NHWC
    # directly so no layout transpose is needed before the kernel).
    out = jax.lax.conv_general_dilated(
        img_nchw, backbone_w, window_strides=(4, 4), padding="VALID",
        dimension_numbers=("NCHW", "OIHW", "NHWC"))
    return jax.nn.relu(out)


if __name__ == "__main__":
    key = jax.random.PRNGKey(0)
    k_img, k_bb, k_rc = jax.random.split(key, 3)

    # small shapes consistent with the module (real model: Cf=2048, hid=args.hidden_size,
    # 15x15 feature map); W=7 here exercises the W->W_p=8 padding path.
    B, Cin, Himg, Wimg = 2, 3, 28, 28
    Cf, hid = 256, 128

    img = jax.random.normal(k_img, (B, Cin, Himg, Wimg), dtype=jnp.float32)
    backbone_w = 0.1 * jax.random.normal(k_bb, (Cf, Cin, 4, 4), dtype=jnp.float32)
    rescale_w = 0.02 * jax.random.normal(k_rc, (hid, Cf, 1, 1), dtype=jnp.float32)

    feat = standin_backbone(img, backbone_w)          # (2, 7, 7, 256), NHWC
    H, W = feat.shape[1], feat.shape[2]

    tokens, gemb = image_encode(feat, rescale_w)
    jax.block_until_ready((tokens, gemb))

    # pure-JAX reference (same bf16-rounded matmul inputs so only accumulation order differs)
    feat_bf = feat.astype(jnp.bfloat16).astype(jnp.float32)
    w_bf = jnp.transpose(rescale_w[:, :, 0, 0], (1, 0)).astype(jnp.bfloat16).astype(jnp.float32)
    y = jnp.einsum('bhwc,cd->bhwd', feat_bf, w_bf)
    pooled = 0.25 * (y[:, :-1, :-1] + y[:, :-1, 1:] + y[:, 1:, :-1] + y[:, 1:, 1:])
    pooled = jnp.clip(jnp.nan_to_num(pooled, nan=0.0, posinf=1e4, neginf=-1e4), -1e4, 1e4)
    ref_tokens = pooled.reshape(B, (H - 1) * (W - 1), hid)
    ref_global = jnp.max(pooled, axis=(1, 2))[:, None, :]

    assert tokens.shape == (B, (H - 1) * (W - 1), hid)
    assert gemb.shape == (B, 1, hid)
    assert bool(jnp.all(jnp.isfinite(tokens))) and bool(jnp.all(jnp.isfinite(gemb)))
    assert bool(jnp.allclose(tokens, ref_tokens, atol=5e-3, rtol=5e-3))
    assert bool(jnp.allclose(gemb, ref_global, atol=5e-3, rtol=5e-3))
    print("KERNEL_OK")
</pallas_src>

<mosaic_0001>
module attributes {stable_mosaic.version = 11 : i64} {
  func.func @_encoder_kernel(%arg0: i32, %arg1: i32, %arg2: memref<1x7x8x256xbf16, #tpu.memory_space<vmem>>, %arg3: memref<256x128xbf16, #tpu.memory_space<vmem>>, %arg4: memref<1x36x128xf32, #tpu.memory_space<vmem>>, %arg5: memref<1x1x128xf32, #tpu.memory_space<vmem>>, %arg6: memref<7x8x128xf32, #tpu.memory_space<vmem>>) attributes {dimension_semantics = [#tpu.dimension_semantics<parallel>, #tpu.dimension_semantics<parallel>], iteration_bounds = array<i64: 2, 1>, scalar_prefetch = 0 : i64, scratch_operands = 1 : i64, tpu.core_type = #tpu.core_type<tc>, window_params = [{transform_indices = @transform_0, window_bounds = array<i64: 1, 7, 8, 256>}, {transform_indices = @transform_1, window_bounds = array<i64: 256, 128>}, {transform_indices = @transform_2, window_bounds = array<i64: 1, 36, 128>}, {transform_indices = @transform_3, window_bounds = array<i64: 1, 1, 128>}]} {
    %c0 = arith.constant 0 : index
    %c0_0 = arith.constant 0 : index
    %c0_1 = arith.constant 0 : index
    %c0_2 = arith.constant 0 : index
    %0 = vector.load %arg2[%c0, %c0_0, %c0_1, %c0_2] : memref<1x7x8x256xbf16, #tpu.memory_space<vmem>>, vector<1x7x8x256xbf16>
    %1 = vector.shape_cast %0 : vector<1x7x8x256xbf16> to vector<56x256xbf16>
    %c0_3 = arith.constant 0 : index
    %c0_4 = arith.constant 0 : index
    %2 = vector.load %arg3[%c0_3, %c0_4] : memref<256x128xbf16, #tpu.memory_space<vmem>>, vector<256x128xbf16>
    %cst = arith.constant dense<0.000000e+00> : vector<56x128xf32>
    %3 = tpu.matmul %1, %2, %cst {dimension_numbers = #tpu.dot_dimension_numbers<[1], [0], [0], [1], [0, 0, 1, 1], [], []>} : vector<56x256xbf16>, vector<256x128xbf16>, vector<56x128xf32> -> vector<56x128xf32>
    %4 = vector.shape_cast %3 : vector<56x128xf32> to vector<7x8x128xf32>
    %c0_5 = arith.constant 0 : index
    %c0_6 = arith.constant 0 : index
    %c0_7 = arith.constant 0 : index
    %5 = vector.load %arg6[%c0_5, %c0_6, %c0_7] : memref<7x8x128xf32, #tpu.memory_space<vmem>>, vector<7x8x128xf32>
    tpu.vector_store %arg6[%c0_5, %c0_6, %c0_7], %4 {strides = array<i32>} : memref<7x8x128xf32, #tpu.memory_space<vmem>>, vector<7x8x128xf32>,
    %c0_8 = arith.constant 0 : index
    %c0_9 = arith.constant 0 : index
    %c0_10 = arith.constant 0 : index
    %6 = vector.load %arg6[%c0_8, %c0_9, %c0_10] : memref<7x8x128xf32, #tpu.memory_space<vmem>>, vector<6x8x128xf32>
    %c1 = arith.constant 1 : index
    %c0_11 = arith.constant 0 : index
    %c0_12 = arith.constant 0 : index
    %7 = vector.load %arg6[%c1, %c0_11, %c0_12] : memref<7x8x128xf32, #tpu.memory_space<vmem>>, vector<6x8x128xf32>
    %8 = arith.addf %6, %7 : vector<6x8x128xf32>
    %9 = vector.extract_strided_slice %8 {offsets = [0, 0, 0], sizes = [6, 6, 128], strides = [1, 1, 1]} : vector<6x8x128xf32> to vector<6x6x128xf32>
    %10 = vector.extract_strided_slice %8 {offsets = [0, 1, 0], sizes = [6, 6, 128], strides = [1, 1, 1]} : vector<6x8x128xf32> to vector<6x6x128xf32>
    %11 = arith.addf %9, %10 : vector<6x6x128xf32>
    %cst_13 = arith.constant 2.500000e-01 : f32
    %12 = vector.broadcast %cst_13 : f32 to vector<6x6x128xf32>
    %13 = arith.mulf %11, %12 : vector<6x6x128xf32>
    %14 = arith.cmpf one, %13, %13 : vector<6x6x128xf32>
    %cst_14 = arith.constant -1.000000e+04 : f32
    %cst_15 = arith.constant 1.000000e+04 : f32
    %15 = vector.broadcast %cst_14 : f32 to vector<6x6x128xf32>
    %16 = arith.maximumf %15, %13 : vector<6x6x128xf32>
    %17 = vector.broadcast %cst_15 : f32 to vector<6x6x128xf32>
    %18 = arith.minimumf %17, %16 : vector<6x6x128xf32>
    %cst_16 = arith.constant 0.000000e+00 : f32
    %19 = vector.broadcast %cst_16 : f32 to vector<6x6x128xf32>
    %20 = arith.select %14, %19, %18 : vector<6x6x128xi1>, vector<6x6x128xf32>
    %21 = vector.extract_strided_slice %20 {offsets = [0, 0, 0], sizes = [1, 6, 128], strides = [1, 1, 1]} : vector<6x6x128xf32> to vector<1x6x128xf32>
    %22 = vector.shape_cast %21 : vector<1x6x128xf32> to vector<6x128xf32>
    %c0_17 = arith.constant 0 : index
    %c0_18 = arith.constant 0 : index
    %c0_19 = arith.constant 0 : index
    %23 = vector.load %arg4[%c0_17, %c0_18, %c0_19] : memref<1x36x128xf32, #tpu.memory_space<vmem>>, vector<1x6x128xf32>
    %24 = vector.shape_cast %23 : vector<1x6x128xf32> to vector<6x128xf32>
    %25 = vector.shape_cast %22 : vector<6x128xf32> to vector<1x6x128xf32>
    tpu.vector_store %arg4[%c0_17, %c0_18, %c0_19], %25 {strides = array<i32>} : memref<1x36x128xf32, #tpu.memory_space<vmem>>, vector<1x6x128xf32>,
    %26 = vector.extract_strided_slice %20 {offsets = [1, 0, 0], sizes = [1, 6, 128], strides = [1, 1, 1]} : vector<6x6x128xf32> to vector<1x6x128xf32>
    %27 = vector.shape_cast %26 : vector<1x6x128xf32> to vector<6x128xf32>
    %c0_20 = arith.constant 0 : index
    %c6 = arith.constant 6 : index
    %c0_21 = arith.constant 0 : index
    %28 = vector.load %arg4[%c0_20, %c6, %c0_21] : memref<1x36x128xf32, #tpu.memory_space<vmem>>, vector<1x6x128xf32>
    %29 = vector.shape_cast %28 : vector<1x6x128xf32> to vector<6x128xf32>
    %30 = vector.shape_cast %27 : vector<6x128xf32> to vector<1x6x128xf32>
    tpu.vector_store %arg4[%c0_20, %c6, %c0_21], %30 {strides = array<i32>} : memref<1x36x128xf32, #tpu.memory_space<vmem>>, vector<1x6x128xf32>,
    %31 = vector.extract_strided_slice %20 {offsets = [2, 0, 0], sizes = [1, 6, 128], strides = [1, 1, 1]} : vector<6x6x128xf32> to vector<1x6x128xf32>
    %32 = vector.shape_cast %31 : vector<1x6x128xf32> to vector<6x128xf32>
    %c0_22 = arith.constant 0 : index
    %c12 = arith.constant 12 : index
    %c0_23 = arith.constant 0 : index
    %33 = vector.load %arg4[%c0_22, %c12, %c0_23] : memref<1x36x128xf32, #tpu.memory_space<vmem>>, vector<1x6x128xf32>
    %34 = vector.shape_cast %33 : vector<1x6x128xf32> to vector<6x128xf32>
    %35 = vector.shape_cast %32 : vector<6x128xf32> to vector<1x6x128xf32>
    tpu.vector_store %arg4[%c0_22, %c12, %c0_23], %35 {strides = array<i32>} : memref<1x36x128xf32, #tpu.memory_space<vmem>>, vector<1x6x128xf32>,
    %36 = vector.extract_strided_slice %20 {offsets = [3, 0, 0], sizes = [1, 6, 128], strides = [1, 1, 1]} : vector<6x6x128xf32> to vector<1x6x128xf32>
    %37 = vector.shape_cast %36 : vector<1x6x128xf32> to vector<6x128xf32>
    %c0_24 = arith.constant 0 : index
    %c18 = arith.constant 18 : index
    %c0_25 = arith.constant 0 : index
    %38 = vector.load %arg4[%c0_24, %c18, %c0_25] : memref<1x36x128xf32, #tpu.memory_space<vmem>>, vector<1x6x128xf32>
    %39 = vector.shape_cast %38 : vector<1x6x128xf32> to vector<6x128xf32>
    %40 = vector.shape_cast %37 : vector<6x128xf32> to vector<1x6x128xf32>
    tpu.vector_store %arg4[%c0_24, %c18, %c0_25], %40 {strides = array<i32>} : memref<1x36x128xf32, #tpu.memory_space<vmem>>, vector<1x6x128xf32>,
    %41 = vector.extract_strided_slice %20 {offsets = [4, 0, 0], sizes = [1, 6, 128], strides = [1, 1, 1]} : vector<6x6x128xf32> to vector<1x6x128xf32>
    %42 = vector.shape_cast %41 : vector<1x6x128xf32> to vector<6x128xf32>
    %c0_26 = arith.constant 0 : index
    %c24 = arith.constant 24 : index
    %c0_27 = arith.constant 0 : index
    %43 = vector.load %arg4[%c0_26, %c24, %c0_27] : memref<1x36x128xf32, #tpu.memory_space<vmem>>, vector<1x6x128xf32>
    %44 = vector.shape_cast %43 : vector<1x6x128xf32> to vector<6x128xf32>
    %45 = vector.shape_cast %42 : vector<6x128xf32> to vector<1x6x128xf32>
    tpu.vector_store %arg4[%c0_26, %c24, %c0_27], %45 {strides = array<i32>} : memref<1x36x128xf32, #tpu.memory_space<vmem>>, vector<1x6x128xf32>,
    %46 = vector.extract_strided_slice %20 {offsets = [5, 0, 0], sizes = [1, 6, 128], strides = [1, 1, 1]} : vector<6x6x128xf32> to vector<1x6x128xf32>
    %47 = vector.shape_cast %46 : vector<1x6x128xf32> to vector<6x128xf32>
    %c0_28 = arith.constant 0 : index
    %c30 = arith.constant 30 : index
    %c0_29 = arith.constant 0 : index
    %48 = vector.load %arg4[%c0_28, %c30, %c0_29] : memref<1x36x128xf32, #tpu.memory_space<vmem>>, vector<1x6x128xf32>
    %49 = vector.shape_cast %48 : vector<1x6x128xf32> to vector<6x128xf32>
    %50 = vector.shape_cast %47 : vector<6x128xf32> to vector<1x6x128xf32>
    tpu.vector_store %arg4[%c0_28, %c30, %c0_29], %50 {strides = array<i32>} : memref<1x36x128xf32, #tpu.memory_space<vmem>>, vector<1x6x128xf32>,
    %cst_30 = arith.constant dense<0xFF800000> : vector<6x128xf32>
    %51 = vector.multi_reduction <maximumf>, %20, %cst_30 [0] : vector<6x6x128xf32> to vector<6x128xf32>
    %cst_31 = arith.constant dense<0xFF800000> : vector<128xf32>
    %52 = vector.multi_reduction <maximumf>, %51, %cst_31 [0] : vector<6x128xf32> to vector<128xf32>
    %53 = vector.shape_cast %52 : vector<128xf32> to vector<1x128xf32>
    %c0_32 = arith.constant 0 : index
    %c0_33 = arith.constant 0 : index
    %c0_34 = arith.constant 0 : index
    %54 = vector.load %arg5[%c0_32, %c0_33, %c0_34] : memref<1x1x128xf32, #tpu.memory_space<vmem>>, vector<1x1x128xf32>
    %55 = vector.shape_cast %54 : vector<1x1x128xf32> to vector<1x128xf32>
    %56 = vector.shape_cast %53 : vector<1x128xf32> to vector<1x1x128xf32>
    tpu.vector_store %arg5[%c0_32, %c0_33, %c0_34], %56 {strides = array<i32>} : memref<1x1x128xf32, #tpu.memory_space<vmem>>, vector<1x1x128xf32>,
    return
  }
  func.func @transform_0(%arg0: i32, %arg1: i32) -> (i32, i32, i32, i32) {
    %c0_i32 = arith.constant 0 : i32
    %c0_i32_0 = arith.constant 0 : i32
    %c0_i32_1 = arith.constant 0 : i32
    %c0_i32_2 = arith.constant 0 : i32
    return %arg0, %c0_i32, %c0_i32_0, %c0_i32_1 : i32, i32, i32, i32
  }
  func.func @transform_1(%arg0: i32, %arg1: i32) -> (i32, i32) {
    %c0_i32 = arith.constant 0 : i32
    %c0_i32_0 = arith.constant 0 : i32
    return %c0_i32, %arg1 : i32, i32
  }
  func.func @transform_2(%arg0: i32, %arg1: i32) -> (i32, i32, i32) {
    %c0_i32 = arith.constant 0 : i32
    %c0_i32_0 = arith.constant 0 : i32
    return %arg0, %c0_i32, %arg1 : i32, i32, i32
  }
  func.func @transform_3(%arg0: i32, %arg1: i32) -> (i32, i32, i32) {
    %c0_i32 = arith.constant 0 : i32
    %c0_i32_0 = arith.constant 0 : i32
    return %arg0, %c0_i32, %arg1 : i32, i32, i32
  }
}

</mosaic_0001>

<bundles_post_ra>
// kernel: tpu_custom_call.1
= control target key start
LH: loop header
LB: loop body
LE: loop exit
PB: predicated region body
PF: predicated region fallthrough
CT: control target
= control target key end

     0   :  { %9 = vsyncpa [#allocation4], 0  ;;  %s1356_s0 = inlined_call_operand.hbm [shape: bf16[2,7,8,256], index: 0, kind: input, shape index: {}]   ;;  %s1357_s1 = inlined_call_operand.hbm [shape: bf16[256,128], index: 1, kind: input, shape index: {}]   ;;  %s1358_s2 = inlined_call_operand.vmem [shape: f32[2,36,128], index: 2, kind: output, shape index: {0}]   ;;  %s1359_s3 = inlined_call_operand.hbm [shape: f32[2,1,128], index: 3, kind: output, shape index: {1}]  }
   0x1   :  { %11 = vsyncpa [#allocation4 + $0x1], 0 }
   0x2   :  { %12 = vsyncpa [#allocation7], 0 }
   0x3   :  { %13 = vsyncpa [#allocation5], 0 }
   0x4   :  { %15 = vsyncpa [#allocation5 + $0x1], 0  ;;  %s1115_s12 = smov 0   ;;  %s1117_s13 = smov 0  }
   0x5   :  { %s1119_s14 = smov 0   ;;  %s1121_s15 = smov 0  }
   0x6   :  { %s1123_s16 = smov 0   ;;  %s1125_s17 = smov 0  }
   0x7 LB: > { %s736_s18 = sadd.s32 4294967295, %s1086_s17   ;;  %s737_s19 = sadd.s32 4294967294, %s1086_s17   ;;  %s1086_s17 = sphi %s1125_s17, %s21_s17   ;;  %s1082_s16 = sphi %s1123_s16, %s1382_s16   ;;  %s1078_s15 = sphi %s1121_s15, %s1381_s15   ;;  %s1074_s14 = sphi %s1119_s14, %s1380_s14   ;;  %s1070_s13 = sphi %s1117_s13, %s1379_s13   ;;  %s1066_s12 = sphi %s1115_s12, %s1378_s12  }
   0x8   : > { %p53_p0 = scmp.ne.s32.totalorder %s1070_s13, %s1066_s12  ;;  %p1149_p1 = scmp.eq.s32.totalorder %s736_s18, 0 }
   0x9   : > { %p1153_p2 = scmp.eq.s32.totalorder %s736_s18, 1  ;;  %p139_p3 = scmp.eq.s32.totalorder %s737_s19, 1 }
   0xa   : > { %s1364_s20 = scalar_select %p1149_p1, 1, 0 }
   0xb   : > { %s1365_s21 = scalar_select %p1153_p2, 1, 0 }
   0xc   : > { %p1159_p4 = por %p1149_p1, %p53_p0  ;;  %p738_p5 = scmp.ge.s32.totalorder %s1086_s17, 1 }
   0xd   : > { %p1164_p6 = por %p139_p3, %p53_p0  ;;  %p146_p7 = scmp.lt.s32.totalorder %s1086_s17, 3 }
   0xe   : > { %s1366_s22 = scalar_select %p1159_p4, 1, 0 }
   0xf   : > { %s1367_s23 = scalar_select %p1164_p6, 1, 0 }
  0x10   : > { %p1169_p8 = pnand %p738_p5, %p146_p7  ;;  %s1088_s25 = smov [#allocation6]  }
  0x11   : > { %s160_s26 = sshll.u32 %s1088_s25, 4  ;;  %s33_s28 = sadd.s32 1, %s1082_s16  ;;  %s161_s26 = int_to_ptr.vmem [resolvable:$true] %s160_s26 }
  0x12   : > { %s1368_s24 = scalar_select %p1169_p8, 1, 0 }
  0x13   : > { %p846_p9 = pneg %p1169_p8  ;;  %s942_s4 = scalar_lea.hbm %s1357_s1, 2048 }
  0x14   : > { %p943_p12 = scmp.ne.s32.totalorder %s1357_s1, %s942_s4  ;;  %p949_p5 = scmp.lt.u32.totalorder %s942_s4, %s1357_s1 }
  0x15   : > { %p1178_p11 = pnand %p846_p9, %p1149_p1 }
  0x17   : > { %p944_p13 = pneg %p1178_p11 }
  0x19   : > { %p945_p0 = pnand %p944_p13, %p943_p12 }
  0x1b   : > { %p946_p3 = pneg %p945_p0 }
  0x1d   : > { %p951_p7 = pnand %p949_p5, %p946_p3 }
  0x1f   : > { %954 = shalt.err (!%p951_p7)
}
  0x20   : > { %s955_s9 = scalar_lea.vmem %s161_s26, 2048  ;;  %p963_p1 = scmp.lt.s32.totalorder %s161_s26, %s161_s26 }
  0x21   : > { %p956_p9 = scmp.ne.s32.totalorder %s161_s26, %s955_s9  ;;  %p964_p4 = scmp.lt.s32.totalorder %s955_s9, %s955_s9 }
  0x23   : > { %p958_p10 = pnand %p956_p9, %p944_p13  ;;  %p965_p8 = por %p964_p4, %p963_p1 }
  0x25   : > { %p959_p6 = pneg %p958_p10 }
  0x27   : > { %p966_p2 = pnand %p965_p8, %p959_p6 }
  0x29   : > { %969 = shalt.err (!%p966_p2)
}
  0x2a   : > { %s1089_s10 = smov 64   ;;  %s1090_s11 = smov 4  }
  0x2b   : > { %849 = dma.hbm_to_vmem [thread:$0]  (!%p1178_p11), %s1357_s1, 2048, %s161_s26, [#allocation7], %s1089_s10, %s1089_s10, %s1090_s11  }
  0x2c   : > { %p35_p1 = scmp.ge.s32.totalorder %s33_s28, 2  ;;  %s40_s25 = sadd.s32 1, %s1074_s14 }
  0x2d   : > { %p47_p2 = scmp.ne.s32.totalorder %s1074_s14, %s1070_s13  ;;  %p48_p4 = scmp.eq.s32.totalorder %s1086_s17, 0 }
  0x2e   : > { %s1384_s28 = smov (%p35_p1, %s33_s28), 0  ;;  %p1370_p8 = scmp.ne.s32.totalorder %s1365_s21, 0 }
  0x2f   : > { %p49_p6 = por %p48_p4, %p47_p2  ;;  %s37_s30 = ssub.s32 %s1082_s16, %s1384_s28 }
  0x30   : > { %p1207_p10 = por %p1370_p8, %p47_p2  ;;  %p859_p12 = scmp.lt.s32.totalorder %s1086_s17, 2 }
  0x31   : > { %p38_p13 = scmp.eq.s32.totalorder %s37_s30, 0  ;;  %s174_s27 = sand.u32 1, %s1074_s14  }
  0x32   : > { %s834_s4 = smul.u32 56, %s174_s27  ;;  %p1219_p11 = pnand %p859_p12, %p49_p6 }
  0x33   : > { %s1216_s5 = scalar_select %p38_p13, %s1074_s14, %s40_s25  }
  0x34   : > { %s835_s26 = smul.u32 896, %s1082_s16  ;;  %s178_s6 = scalar_lea.vmem [#allocation3], %s834_s4 }
  0x35   : > { %s185_s7 = sshll.u32 %s178_s6, 4  ;;  %s1230_s11 = scalar_lea.sflag [#allocation4], %s174_s27  ;;  %s1228_s7 = int_to_ptr.vmem [resolvable:$true] %s185_s7 }
  0x36   : > { %s1226_s10 = scalar_lea.hbm %s1356_s0, %s835_s26  ;;  %p972_p3 = pneg %p1219_p11 }
  0x37   : > { %s970_s18 = scalar_lea.hbm %s1226_s10, 896  ;;  %s975_s30 = scalar_lea.hbm %s1356_s0, 1792 }
  0x38   : > { %p971_p0 = scmp.ne.s32.totalorder %s1226_s10, %s970_s18  ;;  %p976_p9 = scmp.lt.u32.totalorder %s1226_s10, %s1356_s0 }
  0x39   : > { %p977_p1 = scmp.lt.u32.totalorder %s975_s30, %s970_s18  ;;  %p979_p4 = scmp.lt.u32.totalorder %s970_s18, %s1226_s10 }
  0x3a   : > { %p973_p5 = pnand %p972_p3, %p971_p0 }
  0x3b   : > { %p978_p2 = por %p977_p1, %p976_p9 }
  0x3c   : > { %p974_p7 = pneg %p973_p5 }
  0x3d   : > { %p980_p6 = por %p979_p4, %p978_p2 }
  0x3f   : > { %p981_p8 = pnand %p980_p6, %p974_p7 }
  0x41   : > { %984 = shalt.err (!%p981_p8)
}
  0x42   : > { %s985_s27 = scalar_lea.vmem %s1228_s7, 896  ;;  %s1091_s6 = smov [#allocation3]  }
  0x43   : > { %p986_p12 = scmp.ne.s32.totalorder %s1228_s7, %s985_s27  ;;  %s990_s9 = sshll.u32 %s1091_s6, 4  ;;  %s991_s9 = int_to_ptr.vmem [resolvable:$false] %s990_s9 }
  0x44   : > { %s992_s21 = scalar_lea.vmem %s991_s9, 1792  ;;  %p993_p5 = scmp.lt.s32.totalorder %s1228_s7, %s991_s9 }
  0x45   : > { %p988_p13 = pnand %p986_p12, %p972_p3  ;;  %p994_p9 = scmp.lt.s32.totalorder %s992_s21, %s985_s27 }
  0x47   : > { %p989_p0 = pneg %p988_p13  ;;  %p995_p1 = por %p994_p9, %p993_p5 }
  0x49   : > { %p996_p2 = pnand %p995_p1, %p989_p0 }
  0x4b   : > { %999 = shalt.err (!%p996_p2)
}
  0x4c   : > { %s1092_s18 = smov 128   ;;  %s1093_s19 = smov 8  }
  0x4d   : > { %853 = dma.hbm_to_vmem [thread:$0]  (!%p1219_p11), %s1226_s10, 896, %s1228_s7, %s1230_s11, %s1092_s18, %s1092_s18, %s1093_s19  }
  0x4e   : > { %p1373_p3 = scmp.ne.s32.totalorder %s1368_s24, 0 }
  0x4f   : > { %s1261_s25 = sand.u32 (!%p1373_p3), 1, %s1070_s13   ;;  %p1374_p7 = scmp.ne.s32.totalorder (!%p1373_p3), %s1366_s22, 0 }
  0x50   : > { %197 = sbr.rel (%p1373_p3) target bundleno = 395 (0x18b), region = 28  ;;  %s200_s4 = scalar_lea.sflag (!%p1373_p3), [#allocation4], %s1261_s25 }
  0x51   : > { %s836_s30 = smul.u32 (!%p1373_p3), 56, %s1261_s25 }
  0x53   : > { %s1265_s26 = scalar_lea.vmem (!%p1373_p3), [#allocation3], %s836_s30 }
  0x57   : > { %1053 = dma.done.wait (%p1374_p7), %s200_s4, 896  }
  0x58   : > { %1055 = vsyncadd (%p1374_p7), %s200_s4, 4294966400  ;;  %p1375_p11 = scmp.ne.s32.totalorder %s1364_s20, 0 }
  0x5a   : > { %1057 = dma.done.wait (%p1375_p11), [#allocation7], 2048  }
  0x5b   : > { %1059 = vsyncadd (%p1375_p11), [#allocation7], 4294965248  ;;  %v915_v0 = vld [vmem:[#allocation6 + $0x40] sm:$0xff]   ;;  %v917_v2 = vld [vmem:[#allocation6 + $0x48] sm:$0xff]   ;;  %p237_p4 = scmp.lt.s32.totalorder %s1078_s15, 1  ;;  %vm568_vm0 = vcmask 1045504  }
  0x5c   : > { %v916_v1 = vld [vmem:[#allocation6] sm:$0xff]   ;;  %778 = vmatprep.subr.bf16.mxu0 %v915_v0  ;;  %818 = vmatprep.subr.bf16.mxu1 %v915_v0  ;;  %v918_v3 = vld [vmem:[#allocation6 + $0x8] sm:$0xff]   ;;  %v919_v4 = vld [vmem:[#allocation6 + $0x50] sm:$0xff]   ;;  %s775_s10 = sshll.u32 %s1078_s15, 4  ;;  %s236_s11 = scalar_lea.vmem [#allocation8], %s1261_s25 }
  0x5d   : > { %779 = vmatpush3.bf16.msra.mxu0 %v916_v1  ;;  %826 = vmatpush3.bf16.msra.mxu1 %v916_v1  ;;  %v920_v5 = vld [vmem:[#allocation6 + $0x10] sm:$0xff]   ;;  %v921_v6 = vld [vmem:[#allocation6 + $0x58] sm:$0xff]   ;;  %v923_v8 = vld [vmem:[#allocation6 + $0x60] sm:$0xff]   ;;  %s238_s20 = scalar_select %p237_p4, %s1078_s15, 1 }
  0x5e   : > { %780 = vmatprep.subr.bf16.mxu0 %v917_v2  ;;  %819 = vmatprep.subr.bf16.mxu1 %v917_v2  ;;  %v922_v7 = vld [vmem:[#allocation6 + $0x18] sm:$0xff]   ;;  %v924_v9 = vld [vmem:[#allocation6 + $0x20] sm:$0xff]   ;;  %v925_v10 = vld [vmem:[#allocation6 + $0x68] sm:$0xff]   ;;  %s613_s27 = sshll.u32 %s236_s11, 4  ;;  %s1307_s21 = scalar_lea.hbm %s1359_s3, %s775_s10  ;;  %s1309_s27 = int_to_ptr.vmem [resolvable:$true] %s613_s27 }
  0x5f   : > { %v933_v11 = vld [vmem:[%s1265_s26 + $0x4] ss:$8 sps:$4 sm:$0xff]   ;;  %v252_v18 = vld [vmem:[%s1265_s26 + $0x30] sm:$0xff]  ;;  %v931_v19 = vld [vmem:[%s1265_s26] ss:$8 sps:$4 sm:$0xff]   ;;  %s837_s22 = smul.u32 40, %s238_s20 }
  0x60   : > { %v936_v12 = vld [vmem:[%s1265_s26 + $0x24] ss:$8 sps:$4 sm:$0xff]   ;;  %450 = vmatprep.mubr.bf16.mxu0 %v933_v11  ;;  %v934_v20 = vld [vmem:[%s1265_s26 + $0x20] ss:$8 sps:$4 sm:$0xff]   ;;  %v937_v21 = vld [vmem:[%s1265_s26 + $0x14] ss:$8 sps:$4 sm:$0xff]   ;;  %v752_v22 = vcombine.high %v252_v18, %v252_v18  ;;  %v751_v24 = vcombine.low %v252_v18, %v252_v18 }
  0x61   : > { %781 = vmatpush3.bf16.msra.mxu0 %v918_v3  ;;  %827 = vmatpush3.bf16.msra.mxu1 %v918_v3  ;;  %v926_v13 = vld [vmem:[#allocation6 + $0x28] sm:$0xff]   ;;  %v927_v14 = vld [vmem:[#allocation6 + $0x70] sm:$0xff]   ;;  %v929_v16 = vld [vmem:[#allocation6 + $0x78] sm:$0xff]   ;;  %s1287_s8 = scalar_lea.vmem %s1358_s2, %s837_s22  ;;  %s597_s18 = scalar_lea.sflag [#allocation5], %s1261_s25 }
  0x62   : > { %782 = vmatprep.subr.bf16.mxu0 %v919_v4  ;;  %820 = vmatprep.subr.bf16.mxu1 %v919_v4  ;;  %v928_v15 = vld [vmem:[#allocation6 + $0x30] sm:$0xff]   ;;  %v930_v17 = vld [vmem:[#allocation6 + $0x38] sm:$0xff]   ;;  %s1000_s19 = scalar_lea.vmem %s1309_s27, 16  ;;  %s1094_s15 = smov [#allocation8]  }
  0x63   : > { %466 = vmatprep.mubr.bf16.mxu1 %v936_v12  ;;  %v940_v23 = vld [vmem:[%s1265_s26 + $0x10] ss:$8 sps:$4 sm:$0xff]   ;;  %p1001_p6 = scmp.ne.s32.totalorder %s1309_s27, %s1000_s19  ;;  %s1004_s30 = sshll.u32 %s1094_s15, 4  ;;  %s1005_s30 = int_to_ptr.vmem [resolvable:$false] %s1004_s30 }
  0x64   : > { %s1006_s4 = scalar_lea.vmem %s1005_s30, 32  ;;  %p1007_p13 = scmp.lt.s32.totalorder %s1309_s27, %s1005_s30 }
  0x65   : > { %783 = vmatpush3.bf16.msra.mxu0 %v920_v5  ;;  %828 = vmatpush3.bf16.msra.mxu1 %v920_v5  ;;  %p1002_p8 = pnand %p1001_p6, %p1207_p10  ;;  %p1008_p0 = scmp.lt.s32.totalorder %s1006_s4, %s1000_s19 }
  0x66   : > { %784 = vmatprep.subr.bf16.mxu0 %v921_v6  ;;  %821 = vmatprep.subr.bf16.mxu1 %v921_v6 }
  0x67   : > { %p1003_p12 = pneg %p1002_p8  ;;  %p1009_p5 = por %p1008_p0, %p1007_p13 }
  0x69   : > { %785 = vmatpush3.bf16.msra.mxu0 %v922_v7  ;;  %829 = vmatpush3.bf16.msra.mxu1 %v922_v7  ;;  %p1010_p9 = pnand %p1009_p5, %p1003_p12 }
  0x6a   : > { %786 = vmatprep.subr.bf16.mxu0 %v923_v8  ;;  %822 = vmatprep.subr.bf16.mxu1 %v923_v8 }
  0x6d   : > { %787 = vmatpush3.bf16.msra.mxu0 %v924_v9  ;;  %830 = vmatpush3.bf16.msra.mxu1 %v924_v9 }
  0x6e   : > { %788 = vmatprep.subr.bf16.mxu0 %v925_v10  ;;  %823 = vmatprep.subr.bf16.mxu1 %v925_v10 }
  0x71   : > { %789 = vmatpush3.bf16.msra.mxu0 %v926_v13  ;;  %831 = vmatpush3.bf16.msra.mxu1 %v926_v13 }
  0x72   : > { %790 = vmatprep.subr.bf16.mxu0 %v927_v14  ;;  %824 = vmatprep.subr.bf16.mxu1 %v927_v14 }
  0x75   : > { %791 = vmatpush3.bf16.msra.mxu0 %v928_v15  ;;  %832 = vmatpush3.bf16.msra.mxu1 %v928_v15 }
  0x76   : > { %792 = vmatprep.subr.bf16.mxu0 %v929_v16  ;;  %825 = vmatprep.subr.bf16.mxu1 %v929_v16 }
  0x79   : > { %793 = vmatpush3.bf16.msra.mxu0 %v930_v17  ;;  %833 = vmatpush3.bf16.msra.mxu1 %v930_v17 }
  0x7c   : > { %451 = vmatmul.mubr.bf16.vlgmr.msra.gmra.mrb[0].mxu0 %v931_v19  ;;  %467 = vmatmul.mubr.bf16.vlgmr.msra.gmra.mrb[0].mxu1 %v934_v20 }
  0x7d   : > { %458 = vmatprep.mubr.bf16.mxu0 %v937_v21  ;;  %474 = vmatprep.mubr.bf16.mxu1 %v752_v22 }
  0x84   : > { %459 = vmatmul.mubr.bf16.gmra.mrb[4].mxu0 %v940_v23  ;;  %475 = vmatmul.mubr.bf16.gmra.mrb[4].mxu1 %v751_v24 }
 0x14f   : > { %v794_v25 = vpop.f32.mrb[0].mxu0  ;;  %v806_v26 = vpop.f32.mrb[0].mxu1 }
 0x150   : > { %v795_v27 = vpop.f32.mrb[1].mxu0  ;;  %v807_v28 = vpop.f32.mrb[1].mxu1 }
 0x151   : > { %v796_v29 = vadd.f32 %v795_v27, %v794_v25  ;;  %v808_v30 = vadd.f32 %v807_v28, %v806_v26  ;;  %v797_v31 = vpop.f32.mrb[2].mxu0  ;;  %v809_v32 = vpop.f32.mrb[2].mxu1 }
 0x152   : > { %v798_v33 = vpop.f32.mrb[3].mxu0  ;;  %v810_v34 = vpop.f32.mrb[3].mxu1 }
 0x153   : > { %v799_v35 = vadd.f32 %v798_v33, %v797_v31  ;;  %v811_v36 = vadd.f32 %v810_v34, %v809_v32 }
 0x155   : > { %v502_v37 = vadd.f32 %v799_v35, %v796_v29  ;;  %v506_v38 = vadd.f32 %v811_v36, %v808_v30 }
 0x157   : > { %v514_v39 = vrot.slane %v502_v37, 1  ;;  %v518_v40 = vrot.slane %v506_v38, 1  ;;  %v800_v41 = vpop.f32.mrb[4].mxu0  ;;  %v812_v42 = vpop.f32.mrb[4].mxu1 }
 0x158   : > { %v801_v43 = vpop.f32.mrb[5].mxu0  ;;  %v813_v44 = vpop.f32.mrb[5].mxu1 }
 0x159   : > { %v526_v45 = vadd.f32 %v514_v39, %v502_v37  ;;  %v530_v46 = vadd.f32 %v518_v40, %v506_v38  ;;  %v802_v47 = vadd.f32 %v801_v43, %v800_v41  ;;  %v814_v48 = vadd.f32 %v813_v44, %v812_v42  ;;  %v803_v49 = vpop.f32.mrb[6].mxu0  ;;  %v815_v50 = vpop.f32.mrb[6].mxu1 }
 0x15a   : > { %v804_v51 = vpop.f32.mrb[7].mxu0  ;;  %v816_v52 = vpop.f32.mrb[7].mxu1 }
 0x15b   : > { %v532_v53 = vmul.f32 0.25, %v526_v45  ;;  %v536_v54 = vmul.f32 0.25, %v530_v46  ;;  %v503_v55 = vadd.f32 %v802_v47, %v799_v35  ;;  %v507_v56 = vadd.f32 %v814_v48, %v811_v36 }
 0x15c   : > { %v805_v57 = vadd.f32 %v804_v51, %v803_v49 }
 0x15d   : > { %vm538_vm1 = vcmp.ne.f32.partialorder %v532_v53, %v532_v53  ;;  %v769_v58 = vclamps-f32 %v532_v53, 10000.0  ;;  %vm542_vm2 = vcmp.ne.f32.partialorder %v536_v54, %v536_v54  ;;  %v773_v59 = vclamps-f32 %v536_v54, 10000.0 }
 0x15e   : > { %v515_v60 = vrot.slane %v503_v55, 1  ;;  %v519_v61 = vrot.slane %v507_v56, 1  ;;  %v504_v62 = vadd.f32 %v805_v57, %v802_v47  ;;  %v505_v63 = vadd.f32 %v808_v30, %v805_v57 }
 0x15f   : > { %v556_v0 = vsel %vm538_vm1, 0.0, %v769_v58  ;;  %v560_v1 = vsel %vm542_vm2, 0.0, %v773_v59 }
 0x160   : > { %562 = vst [vmem:[%s1287_s8] sm:$0x3f] %v556_v0  ;;  %v569_v2 = vsel %vm568_vm0, %v556_v0, -inf  ;;  %566 = vst [vmem:[%s1287_s8 + $0x18] sm:$0x3f] %v560_v1  ;;  %v573_v3 = vsel %vm568_vm0, %v560_v1, -inf  ;;  %v527_v4 = vadd.f32 %v515_v60, %v503_v55  ;;  %v531_v5 = vadd.f32 %v519_v61, %v507_v56 }
 0x161   : > { %v574_v6 = vmax.f32 %v569_v2, %v573_v3  ;;  %v516_v7 = vrot.slane %v504_v62, 1  ;;  %v517_v8 = vrot.slane %v505_v63, 1 }
 0x162   : > { %v533_v9 = vmul.f32 0.25, %v527_v4  ;;  %v537_v10 = vmul.f32 0.25, %v531_v5 }
 0x163   : > { %v528_v11 = vadd.f32 %v516_v7, %v504_v62  ;;  %v529_v12 = vadd.f32 %v517_v8, %v505_v63 }
 0x164   : > { %vm539_vm3 = vcmp.ne.f32.partialorder %v533_v9, %v533_v9  ;;  %v770_v13 = vclamps-f32 %v533_v9, 10000.0  ;;  %vm543_vm4 = vcmp.ne.f32.partialorder %v537_v10, %v537_v10  ;;  %v774_v14 = vclamps-f32 %v537_v10, 10000.0 }
 0x165   : > { %v534_v15 = vmul.f32 0.25, %v528_v11  ;;  %v535_v16 = vmul.f32 0.25, %v529_v12 }
 0x166   : > { %v557_v17 = vsel %vm539_vm3, 0.0, %v770_v13  ;;  %v561_v18 = vsel %vm543_vm4, 0.0, %v774_v14 }
 0x167   : > { %563 = vst [vmem:[%s1287_s8 + $0x6] sm:$0x3f] %v557_v17  ;;  %v570_v19 = vsel %vm568_vm0, %v557_v17, -inf  ;;  %567 = vst [vmem:[%s1287_s8 + $0x1e] sm:$0x3f] %v561_v18  ;;  %v575_v20 = vsel %vm568_vm0, %v561_v18, -inf  ;;  %vm540_vm5 = vcmp.ne.f32.partialorder %v534_v15, %v534_v15  ;;  %vm541_vm6 = vcmp.ne.f32.partialorder %v535_v16, %v535_v16 }
 0x168   : > { %v576_v21 = vmax.f32 %v570_v19, %v575_v20  ;;  %v771_v22 = vclamps-f32 %v534_v15, 10000.0  ;;  %v772_v23 = vclamps-f32 %v535_v16, 10000.0 }
 0x16a   : > { %v577_v24 = vmax.f32 %v574_v6, %v576_v21  ;;  %v558_v25 = vsel %vm540_vm5, 0.0, %v771_v22  ;;  %v559_v26 = vsel %vm541_vm6, 0.0, %v772_v23 }
 0x16b   : > { %564 = vst [vmem:[%s1287_s8 + $0xc] sm:$0x3f] %v558_v25  ;;  %565 = vst [vmem:[%s1287_s8 + $0x12] sm:$0x3f] %v559_v26  ;;  %v571_v27 = vsel %vm568_vm0, %v558_v25, -inf  ;;  %v572_v28 = vsel %vm568_vm0, %v559_v26, -inf }
 0x16c   : > { %v578_v29 = vmax.f32 %v571_v27, %v572_v28 }
 0x16e   : > { %v579_v30 = vmax.f32 %v577_v24, %v578_v29 }
 0x170   : > { %v580_v31 = vsel %vm568_vm0, %v579_v30, -inf }
 0x171   : > { %v581_v32 = vrot.slane %v580_v31, 4 }
 0x173   : > { %v582_v33 = vmax.f32 %v580_v31, %v581_v32 }
 0x175   : > { %v583_v34 = vrot.slane %v582_v33, 2 }
 0x177   : > { %v584_v35 = vmax.f32 %v582_v33, %v583_v34 }
 0x179   : > { %v585_v36 = vrot.slane %v584_v35, 1 }
 0x17b   : > { %v586_v37 = vmax.f32 %v584_v35, %v585_v36 }
 0x17d   : > { %587 = vst [vmem:[%s236_s11] sm:$0x1] %v586_v37 }
 0x17e   : > { %1013 = shalt.err (!%p1010_p9)
}
 0x17f   : > { %s1014_s25 = scalar_lea.hbm %s1307_s21, 16  ;;  %s1018_s22 = scalar_lea.hbm %s1359_s3, 32 }
 0x180   : > { %p1015_p1 = scmp.ne.s32.totalorder %s1307_s21, %s1014_s25  ;;  %p1019_p7 = scmp.lt.u32.totalorder %s1307_s21, %s1359_s3 }
 0x181   : > { %p1020_p11 = scmp.lt.u32.totalorder %s1018_s22, %s1014_s25  ;;  %p1022_p6 = scmp.lt.u32.totalorder %s1014_s25, %s1307_s21 }
 0x182   : > { %p1016_p2 = pnand %p1015_p1, %p1207_p10 }
 0x183   : > { %p1021_p4 = por %p1020_p11, %p1019_p7 }
 0x184   : > { %p1017_p3 = pneg %p1016_p2 }
 0x185   : > { %p1023_p8 = por %p1022_p6, %p1021_p4 }
 0x187   : > { %p1024_p12 = pnand %p1023_p8, %p1017_p3 }
 0x189   : > { %1027 = shalt.err (!%p1024_p12)
}
 0x18a   : > { %844 = dma.vmem_to_hbm [thread:$0]  (%p1207_p10), %s1309_s27, 16, %s1307_s21, %s597_s18  }
 0x18b PF: > { %s636_s8 = sand.u32 1, %s1066_s12   ;;  %p1376_p13 = scmp.ne.s32.totalorder %s1367_s23, 0 }
 0x18c   : > { %p1377_p0 = scmp.ge.s32.totalorder %s1086_s17, 2  ;;  %s637_s10 = scalar_lea.sflag [#allocation5], %s636_s8 }
 0x18e   : > { %p855_p5 = pnand %p1377_p0, %p1376_p13 }
 0x190   : > { %1061 = dma.done.wait (!%p855_p5), %s637_s10, 16  }
 0x191   : > { %1063 = vsyncadd (!%p855_p5), %s637_s10, 4294967280  ;;  %s21_s17 = sadd.s32 1, %s1086_s17   ;;  %s1378_s12 = smov %s1070_s13 }
 0x192   : > { %p18_p9 = scmp.ge.s32.totalorder %s21_s17, 4   ;;  %s1379_s13 = smov %s1074_s14 }
 0x193   : > { %s1380_s14 = smov %s1216_s5  ;;  %s1381_s15 = smov %s1082_s16 }
 0x194   : > { %s1382_s16 = smov %s1384_s28  ;;  %20 = sbr.rel (!%p18_p9) target bundleno = 7 (0x7), region = 91 }
 0x19b   :  { %641 = vsyncpa [#allocation4], 1 }
 0x19c   :  { %643 = vsyncpa [#allocation4 + $0x1], 1 }
 0x19d   :  { %644 = vsyncpa [#allocation7], 1 }
 0x19e   :  { %645 = vsyncpa [#allocation5], 1 }
 0x19f   :  { %647 = vsyncpa [#allocation5 + $0x1], 1 }

</bundles_post_ra>
